<compile_context>
chip_gen: v5e
topology: v5e:2x2
jax: 0.10.0
libtpu: 0.0.40
codegen_flags: <defaults>
</compile_context>

<pallas_src>
import functools
import math

import jax
import jax.numpy as jnp
from jax.experimental import pallas as pl
from jax.experimental.pallas import tpu as pltpu


_MIN_GRID_STEPS = 8          # enough steps to pipeline & shard across 2 TCs
_MIN_BLOCK_BYTES = 256 * 1024  # don't shrink blocks below this just for steps


def _same_pad_amounts(in_h, in_w, kernel_size, stride):
    kh, kw = kernel_size
    sh, sw = stride
    out_h = math.ceil(float(in_h) / float(sh))
    out_w = math.ceil(float(in_w) / float(sw))
    pad_along_h = max((out_h - 1) * sh + kh - in_h, 0)
    pad_along_w = max((out_w - 1) * sw + kw - in_w, 0)
    pad_top = pad_along_h // 2
    pad_left = pad_along_w // 2
    return pad_top, pad_along_h - pad_top, pad_left, pad_along_w - pad_left


def _vmem_capacity_bytes():
    """Best-effort physical VMEM query; conservative fallback."""
    try:
        info = pltpu.get_tpu_info()
        for name in ("vmem_capacity_bytes", "vmem_size_bytes", "vmem_bytes"):
            v = getattr(info, name, None)
            if isinstance(v, int) and v > 0:
                return v
    except Exception:  # noqa: BLE001 - any failure -> conservative default
        pass
    return 64 * 1024 * 1024  # assume v7x-class (smallest) if unknown


def _budget_and_limit():
    """(per-block in+out byte budget, vmem_limit_bytes), generation-aware."""
    vmem = _vmem_capacity_bytes()
    if vmem >= 100 * 1024 * 1024:          # v5e / v6e class: 128 MiB physical
        return 20 * 1024 * 1024, 64 * 1024 * 1024
    return 10 * 1024 * 1024, 32 * 1024 * 1024   # v7x class: 64 MiB physical


# --------------------------------------------------------------------------
# Kernel A: whole spatial plane per block, grid tiles (batch, channel).
# --------------------------------------------------------------------------
def _pad_kernel_whole(x_ref, o_ref, *, pad_top, pad_bottom, pad_left,
                      pad_right, in_h, in_w):
    dt = o_ref.dtype
    bn, ct, out_h, out_w = o_ref.shape
    # Interior window <- input data (one big store; every element written once).
    o_ref[:, :, pad_top:pad_top + in_h, pad_left:pad_left + in_w] = x_ref[...]
    # Border strips <- zeros (only the strips that actually exist).
    if pad_top:
        o_ref[:, :, :pad_top, :] = jnp.zeros((bn, ct, pad_top, out_w), dt)
    if pad_bottom:
        o_ref[:, :, pad_top + in_h:, :] = jnp.zeros(
            (bn, ct, pad_bottom, out_w), dt)
    if pad_left:
        o_ref[:, :, pad_top:pad_top + in_h, :pad_left] = jnp.zeros(
            (bn, ct, in_h, pad_left), dt)
    if pad_right:
        o_ref[:, :, pad_top:pad_top + in_h, pad_left + in_w:] = jnp.zeros(
            (bn, ct, in_h, pad_right), dt)


# --------------------------------------------------------------------------
# Kernel B: row-tiled path.  Grid = (N, C, H_out tiles), H innermost and
# sequential ("arbitrary").  The first pad_top rows of each output tile come
# from the previous input tile's tail, carried in a tiny VMEM scratch.
# --------------------------------------------------------------------------
def _pad_kernel_rows(x_ref, o_ref, *carry, pad_top, pad_left, pad_right,
                     in_h, th):
    dt = o_ref.dtype
    bn, ct, _, in_w = x_ref.shape
    hi = pl.program_id(2)
    row0 = hi * th                    # first output row of this tile
    cur = x_ref[...]                  # input rows [row0, row0+th) (tail of the
                                      # last tile may be out-of-bounds garbage)

    if pad_top:
        carry_ref, = carry

        @pl.when(hi == 0)
        def _init():                  # image's top pad rows are zeros
            carry_ref[...] = jnp.zeros_like(carry_ref)

        head = carry_ref[...]         # input rows [row0 - pad_top, row0)
        r = row0 + jax.lax.broadcasted_iota(jnp.int32, (1, 1, pad_top, 1), 2)
        head = jnp.where(r < pad_top + in_h, head, jnp.zeros_like(head))
        o_ref[:, :, :pad_top, pad_left:pad_left + in_w] = head
        main = cur[:, :, :th - pad_top, :]
        carry_ref[...] = cur[:, :, th - pad_top:, :]   # next tile's head
    else:
        main = cur

    # Zero rows past the valid data band (bottom pad + ragged / clamped tail).
    r = (row0 + pad_top
         + jax.lax.broadcasted_iota(jnp.int32, (1, 1, th - pad_top, 1), 2))
    main = jnp.where(r < pad_top + in_h, main, jnp.zeros_like(main))
    o_ref[:, :, pad_top:, pad_left:pad_left + in_w] = main

    # Left / right zero strips (full tile height, written exactly once).
    if pad_left:
        o_ref[:, :, :, :pad_left] = jnp.zeros((bn, ct, th, pad_left), dt)
    if pad_right:
        o_ref[:, :, :, pad_left + in_w:] = jnp.zeros((bn, ct, th, pad_right), dt)


# --------------------------------------------------------------------------
# Wrapper
# --------------------------------------------------------------------------
def conv2d_same_pad(x, kernel_size, stride, *, block_rows=None):
    """Equivalent of Conv2dSamePad.forward for NCHW input `x`.

    block_rows: optional override to force the row-tiled path with the given
    output-row tile size (must be a multiple of 8); mainly for testing/tuning.
    """
    kernel_size = (tuple(kernel_size) if isinstance(kernel_size, (list, tuple))
                   else (kernel_size, kernel_size))
    stride = (tuple(stride) if isinstance(stride, (list, tuple))
              else (stride, stride))

    n, c, in_h, in_w = x.shape
    pt, pb, plf, prg = _same_pad_amounts(in_h, in_w, kernel_size, stride)

    # Fast path: SAME padding is a no-op -> skip the kernel entirely.
    if pt == 0 and pb == 0 and plf == 0 and prg == 0:
        return x

    out_h = in_h + pt + pb
    out_w = in_w + plf + prg
    itemsize = jnp.dtype(x.dtype).itemsize
    budget, vmem_limit = _budget_and_limit()
    plane_bytes = (in_h * in_w + out_h * out_w) * itemsize   # per (b=1, c=1)
    cost = pl.CostEstimate(
        flops=0, transcendentals=0,
        bytes_accessed=(n * c * in_h * in_w + n * c * out_h * out_w) * itemsize)

    # ---- decide whether to tile rows ------------------------------------
    th = None
    if block_rows is not None:
        th = int(block_rows)
    elif plane_bytes > budget:
        # one channel plane alone exceeds the block budget -> must tile H
        row_bytes = (in_w + out_w) * itemsize
        th = max(8, (budget // max(row_bytes, 1)) // 8 * 8)
    if th is not None:
        th = min(th, (in_h // 8) * 8)        # multiple of 8, <= in_h
        if th < 8 or th % 8 != 0 or th <= pt:
            # Cannot tile rows safely (tiny H or huge vertical pad): fall back
            # to whole-plane blocks.  (Pathological shapes only.)
            th = None

    if th is None:
        # ---- whole-plane blocks, grid over (batch tiles, channel tiles) --
        total_units = n * c                       # (batch, channel) "columns"
        units_cap = max(1, min(budget // max(plane_bytes, 1), total_units))
        units_parallel = max(1, pl.cdiv(total_units, _MIN_GRID_STEPS))
        units_floor = max(1, _MIN_BLOCK_BYTES // max(plane_bytes, 1))
        units = min(units_cap, max(units_parallel, min(units_floor, units_cap)))
        ct = min(c, units)
        # Only batch-tile when all channels fit (keeps each DMA block a single
        # contiguous HBM range in NCHW).
        bn = min(n, max(1, units // c)) if ct == c else 1
        grid = (pl.cdiv(n, bn), pl.cdiv(c, ct))

        kernel = functools.partial(
            _pad_kernel_whole, pad_top=pt, pad_bottom=pb,
            pad_left=plf, pad_right=prg, in_h=in_h, in_w=in_w)
        return pl.pallas_call(
            kernel,
            out_shape=jax.ShapeDtypeStruct((n, c, out_h, out_w), x.dtype),
            grid=grid,
            in_specs=[pl.BlockSpec((bn, ct, in_h, in_w),
                                   lambda b, ci: (b, ci, 0, 0))],
            out_specs=pl.BlockSpec((bn, ct, out_h, out_w),
                                   lambda b, ci: (b, ci, 0, 0)),
            compiler_params=pltpu.CompilerParams(
                dimension_semantics=("parallel", "parallel"),
                vmem_limit_bytes=vmem_limit),
            cost_estimate=cost,
        )(x)

    # ---- row-tiled path ---------------------------------------------------
    nh = pl.cdiv(out_h, th)
    max_in_blk = pl.cdiv(in_h, th) - 1     # clamp input block index (the extra
                                           # pad-only output tiles reuse the
                                           # last valid input block; its data
                                           # is masked off in the kernel).
    kernel = functools.partial(
        _pad_kernel_rows, pad_top=pt, pad_left=plf, pad_right=prg,
        in_h=in_h, th=th)
    scratch = [pltpu.VMEM((1, 1, pt, in_w), x.dtype)] if pt else []
    return pl.pallas_call(
        kernel,
        out_shape=jax.ShapeDtypeStruct((n, c, out_h, out_w), x.dtype),
        grid=(n, c, nh),
        in_specs=[pl.BlockSpec(
            (1, 1, th, in_w),
            lambda b, ci, hi: (b, ci, jnp.minimum(hi, max_in_blk), 0))],
        out_specs=pl.BlockSpec((1, 1, th, out_w),
                               lambda b, ci, hi: (b, ci, hi, 0)),
        scratch_shapes=scratch,
        compiler_params=pltpu.CompilerParams(
            dimension_semantics=("parallel", "parallel", "arbitrary"),
            vmem_limit_bytes=vmem_limit),
        cost_estimate=cost,
    )(x)


if __name__ == "__main__":
    key = jax.random.PRNGKey(0)

    def check(x, k, s, **kw):
        y = conv2d_same_pad(x, k, s, **kw)
        jax.block_until_ready(y)
        ks = tuple(k) if isinstance(k, (list, tuple)) else (k, k)
        ss = tuple(s) if isinstance(s, (list, tuple)) else (s, s)
        pt, pb, plf, prg = _same_pad_amounts(x.shape[2], x.shape[3], ks, ss)
        y_ref = jnp.pad(x, ((0, 0), (0, 0), (pt, pb), (plf, prg)))
        assert y.shape == y_ref.shape, (y.shape, y_ref.shape)
        assert jnp.array_equal(y, y_ref), f"mismatch k={k} s={s} kw={kw}"
        return y

    k1, k2, k3 = jax.random.split(key, 3)

    # Whole-plane path.
    x = jax.random.normal(k1, (2, 4, 16, 16), dtype=jnp.float32)
    check(x, 3, 1)                       # symmetric pad of 1 on every side
    check(x, 3, 2)                       # asymmetric pad (0 top/left, 1 b/r)

    # Fast path: SAME pad is a no-op.
    y3 = conv2d_same_pad(x, 2, 2)
    jax.block_until_ready(y3)
    assert y3.shape == x.shape and jnp.array_equal(y3, x), "fast path failed"

    # Odd spatial sizes, C=3, pad=2 on every side.
    x_odd = jax.random.normal(k2, (1, 3, 17, 13), dtype=jnp.float32)
    check(x_odd, 5, 2)

    # Row-tiled (carry) path, forced via block_rows.
    x_rows = jax.random.normal(k3, (1, 2, 32, 16), dtype=jnp.float32)
    check(x_rows, 3, 1, block_rows=8)        # vertical + horizontal pad
    check(x_rows, (1, 3), 1, block_rows=8)   # horizontal pad only (no carry)

    print("KERNEL_OK")
</pallas_src>

<mosaic_0001>
module attributes {stable_mosaic.version = 11 : i64} {
  func.func @_pad_kernel_whole(%arg0: i32, %arg1: i32, %arg2: memref<2x4x16x16xf32, #tpu.memory_space<vmem>>, %arg3: memref<2x4x18x18xf32, #tpu.memory_space<vmem>>) attributes {dimension_semantics = [#tpu.dimension_semantics<parallel>, #tpu.dimension_semantics<parallel>], iteration_bounds = array<i64: 1, 1>, scalar_prefetch = 0 : i64, scratch_operands = 0 : i64, tpu.core_type = #tpu.core_type<tc>, window_params = [{transform_indices = @transform_0, window_bounds = array<i64: 2, 4, 16, 16>}, {transform_indices = @transform_1, window_bounds = array<i64: 2, 4, 18, 18>}]} {
    %c0 = arith.constant 0 : index
    %c0_0 = arith.constant 0 : index
    %c0_1 = arith.constant 0 : index
    %c0_2 = arith.constant 0 : index
    %0 = vector.load %arg2[%c0, %c0_0, %c0_1, %c0_2] : memref<2x4x16x16xf32, #tpu.memory_space<vmem>>, vector<2x4x16x16xf32>
    %c0_3 = arith.constant 0 : index
    %c0_4 = arith.constant 0 : index
    %c1 = arith.constant 1 : index
    %c1_5 = arith.constant 1 : index
    %1 = vector.load %arg3[%c0_3, %c0_4, %c1, %c1_5] : memref<2x4x18x18xf32, #tpu.memory_space<vmem>>, vector<2x4x16x16xf32>
    tpu.vector_store %arg3[%c0_3, %c0_4, %c1, %c1_5], %0 {strides = array<i32>} : memref<2x4x18x18xf32, #tpu.memory_space<vmem>>, vector<2x4x16x16xf32>,
    %cst = arith.constant 0.000000e+00 : f32
    %2 = vector.broadcast %cst : f32 to vector<2x4x1x18xf32>
    %c0_6 = arith.constant 0 : index
    %c0_7 = arith.constant 0 : index
    %c0_8 = arith.constant 0 : index
    %c0_9 = arith.constant 0 : index
    %3 = vector.load %arg3[%c0_6, %c0_7, %c0_8, %c0_9] : memref<2x4x18x18xf32, #tpu.memory_space<vmem>>, vector<2x4x1x18xf32>
    tpu.vector_store %arg3[%c0_6, %c0_7, %c0_8, %c0_9], %2 {strides = array<i32>} : memref<2x4x18x18xf32, #tpu.memory_space<vmem>>, vector<2x4x1x18xf32>,
    %cst_10 = arith.constant 0.000000e+00 : f32
    %4 = vector.broadcast %cst_10 : f32 to vector<2x4x1x18xf32>
    %c0_11 = arith.constant 0 : index
    %c0_12 = arith.constant 0 : index
    %c17 = arith.constant 17 : index
    %c0_13 = arith.constant 0 : index
    %5 = vector.load %arg3[%c0_11, %c0_12, %c17, %c0_13] : memref<2x4x18x18xf32, #tpu.memory_space<vmem>>, vector<2x4x1x18xf32>
    tpu.vector_store %arg3[%c0_11, %c0_12, %c17, %c0_13], %4 {strides = array<i32>} : memref<2x4x18x18xf32, #tpu.memory_space<vmem>>, vector<2x4x1x18xf32>,
    %cst_14 = arith.constant 0.000000e+00 : f32
    %6 = vector.broadcast %cst_14 : f32 to vector<2x4x16x1xf32>
    %c0_15 = arith.constant 0 : index
    %c0_16 = arith.constant 0 : index
    %c1_17 = arith.constant 1 : index
    %c0_18 = arith.constant 0 : index
    %7 = vector.load %arg3[%c0_15, %c0_16, %c1_17, %c0_18] : memref<2x4x18x18xf32, #tpu.memory_space<vmem>>, vector<2x4x16x1xf32>
    tpu.vector_store %arg3[%c0_15, %c0_16, %c1_17, %c0_18], %6 {strides = array<i32>} : memref<2x4x18x18xf32, #tpu.memory_space<vmem>>, vector<2x4x16x1xf32>,
    %cst_19 = arith.constant 0.000000e+00 : f32
    %8 = vector.broadcast %cst_19 : f32 to vector<2x4x16x1xf32>
    %c0_20 = arith.constant 0 : index
    %c0_21 = arith.constant 0 : index
    %c1_22 = arith.constant 1 : index
    %c17_23 = arith.constant 17 : index
    %9 = vector.load %arg3[%c0_20, %c0_21, %c1_22, %c17_23] : memref<2x4x18x18xf32, #tpu.memory_space<vmem>>, vector<2x4x16x1xf32>
    tpu.vector_store %arg3[%c0_20, %c0_21, %c1_22, %c17_23], %8 {strides = array<i32>} : memref<2x4x18x18xf32, #tpu.memory_space<vmem>>, vector<2x4x16x1xf32>,
    return
  }
  func.func @transform_0(%arg0: i32, %arg1: i32) -> (i32, i32, i32, i32) {
    %c0_i32 = arith.constant 0 : i32
    %c0_i32_0 = arith.constant 0 : i32
    %c0_i32_1 = arith.constant 0 : i32
    return %arg0, %arg1, %c0_i32, %c0_i32_0 : i32, i32, i32, i32
  }
  func.func @transform_1(%arg0: i32, %arg1: i32) -> (i32, i32, i32, i32) {
    %c0_i32 = arith.constant 0 : i32
    %c0_i32_0 = arith.constant 0 : i32
    %c0_i32_1 = arith.constant 0 : i32
    return %arg0, %arg1, %c0_i32, %c0_i32_0 : i32, i32, i32, i32
  }
}

</mosaic_0001>

<bundles_post_ra>
// kernel: tpu_custom_call.1
= control target key start
LH: loop header
LB: loop body
LE: loop exit
PB: predicated region body
PF: predicated region fallthrough
CT: control target
= control target key end

     0   :  { %6 = vsyncpa [#allocation3], 0  ;;  %s208_s9 = smov [#allocation2]   ;;  %s209_s11 = smov 128   ;;  %s546_s0 = inlined_call_operand.hbm [shape: f32[2,4,16,16], index: 0, kind: input, shape index: {}]   ;;  %s547_s1 = inlined_call_operand.vmem [shape: f32[2,4,18,18], index: 1, kind: output, shape index: {}]  }
   0x1   :  { %s11_s8 = sshll.u32 %s546_s0, 4  ;;  %s13_s10 = sshll.u32 %s208_s9, 4  ;;  %s12_s8 = int_to_ptr.hbm [resolvable:$true] %s11_s8  ;;  %s14_s10 = int_to_ptr.vmem [resolvable:$true] %s13_s10 }
   0x2   :  { %s210_s12 = smov 8  }
   0x3   :  { %19 = dma.hbm_to_vmem [thread:$0]  %s12_s8, 2048, %s14_s10, [#allocation3], %s209_s11, %s209_s11, %s210_s12  }
   0x4   :  { %206 = dma.done.wait [#allocation3], 2048  }
   0x5   :  { %207 = vsyncadd [#allocation3], 4294965248  ;;  %vm121_vm0 = vcmask 139264   ;;  %v211_v0 = vmov 0.0   ;;  %v24_v1 = vld [vmem:[#allocation2] sm:$0xff]  ;;  %v26_v2 = vld [vmem:[#allocation2 + $0x10] sm:$0xff] }
   0x6   :  { %122 = vst.msk [vmem:[%s547_s1] sm:$0x1] %vm121_vm0, %v211_v0  ;;  %s212_s28 = smov 1   ;;  %v28_v3 = vld [vmem:[#allocation2 + $0x20] sm:$0xff]  ;;  %v25_v4 = vld [vmem:[#allocation2 + $0x8] sm:$0xff]  ;;  %v27_v5 = vld [vmem:[#allocation2 + $0x18] sm:$0xff] }
   0x7   :  { %123 = vst.msk [vmem:[%s547_s1 + $0x18] sm:$0x1] %vm121_vm0, %v211_v0  ;;  %56 = vrot.lane.b32.xlu0 %v24_v1, %s212_s28  ;;  %60 = vrot.lane.b32.xlu1 %v26_v2, %s212_s28  ;;  %v29_v6 = vld [vmem:[#allocation2 + $0x28] sm:$0xff]  ;;  %v30_v7 = vld [vmem:[#allocation2 + $0x30] sm:$0xff]  ;;  %v31_v8 = vld [vmem:[#allocation2 + $0x38] sm:$0xff]  ;;  %vm138_vm1 = vcmask 7168  }
   0x8   :  { %124 = vst.msk [vmem:[%s547_s1 + $0x30] sm:$0x1] %vm121_vm0, %v211_v0  ;;  %64 = vrot.lane.b32.xlu2 %v28_v3, %s212_s28  ;;  %v32_v9 = vld [vmem:[#allocation2 + $0x40] sm:$0xff]  ;;  %v33_v10 = vld [vmem:[#allocation2 + $0x48] sm:$0xff]  ;;  %v34_v11 = vld [vmem:[#allocation2 + $0x50] sm:$0xff]  ;;  %vm104_vm2 = vcmask 138248  }
   0x9   :  { %125 = vst.msk [vmem:[%s547_s1 + $0x48] sm:$0x1] %vm121_vm0, %v211_v0  ;;  %v35_v12 = vld [vmem:[#allocation2 + $0x58] sm:$0xff]  ;;  %v36_v13 = vld [vmem:[#allocation2 + $0x60] sm:$0xff]  ;;  %v37_v14 = vld [vmem:[#allocation2 + $0x68] sm:$0xff]  ;;  %vm155_vm3 = vcmask 146568  }
   0xa   :  { %126 = vst.msk [vmem:[%s547_s1 + $0x60] sm:$0x1] %vm121_vm0, %v211_v0  ;;  %v38_v15 = vld [vmem:[#allocation2 + $0x70] sm:$0xff]  ;;  %v39_v16 = vld [vmem:[#allocation2 + $0x78] sm:$0xff] }
   0xb   :  { %127 = vst.msk [vmem:[%s547_s1 + $0x78] sm:$0x1] %vm121_vm0, %v211_v0 }
   0xc   :  { %128 = vst.msk [vmem:[%s547_s1 + $0x90] sm:$0x1] %vm121_vm0, %v211_v0 }
   0xd   :  { %129 = vst.msk [vmem:[%s547_s1 + $0xa8] sm:$0x1] %vm121_vm0, %v211_v0 }
   0xe   :  { %130 = vst.msk [vmem:[%s547_s1 + $0x11] sm:$0x1] %vm121_vm0, %v211_v0 }
   0xf   :  { %131 = vst.msk [vmem:[%s547_s1 + $0x29] sm:$0x1] %vm121_vm0, %v211_v0  ;;  %58 = vrot.lane.b32.xlu0 %v25_v4, %s212_s28  ;;  %62 = vrot.lane.b32.xlu1 %v27_v5, %s212_s28 }
  0x10   :  { %132 = vst.msk [vmem:[%s547_s1 + $0x41] sm:$0x1] %vm121_vm0, %v211_v0  ;;  %66 = vrot.lane.b32.xlu2 %v29_v6, %s212_s28 }
  0x11   :  { %133 = vst.msk [vmem:[%s547_s1 + $0x59] sm:$0x1] %vm121_vm0, %v211_v0 }
  0x12   :  { %134 = vst.msk [vmem:[%s547_s1 + $0x71] sm:$0x1] %vm121_vm0, %v211_v0 }
  0x13   :  { %135 = vst.msk [vmem:[%s547_s1 + $0x89] sm:$0x1] %vm121_vm0, %v211_v0 }
  0x14   :  { %136 = vst.msk [vmem:[%s547_s1 + $0xa1] sm:$0x1] %vm121_vm0, %v211_v0 }
  0x15   :  { %137 = vst.msk [vmem:[%s547_s1 + $0xb9] sm:$0x1] %vm121_vm0, %v211_v0 }
  0x17   :  { %68 = vrot.lane.b32.xlu0 %v30_v7, %s212_s28  ;;  %70 = vrot.lane.b32.xlu1 %v31_v8, %s212_s28 }
  0x18   :  { %72 = vrot.lane.b32.xlu2 %v32_v9, %s212_s28 }
  0x1f   :  { %74 = vrot.lane.b32.xlu0 %v33_v10, %s212_s28  ;;  %76 = vrot.lane.b32.xlu1 %v34_v11, %s212_s28 }
  0x20   :  { %78 = vrot.lane.b32.xlu2 %v35_v12, %s212_s28 }
  0x27   :  { %80 = vrot.lane.b32.xlu0 %v36_v13, %s212_s28  ;;  %82 = vrot.lane.b32.xlu1 %v37_v14, %s212_s28 }
  0x28   :  { %84 = vrot.lane.b32.xlu2 %v38_v15, %s212_s28 }
  0x2f   :  { %86 = vrot.lane.b32.xlu0 %v39_v16, %s212_s28 }
  0x62   :  { %v65_v17 = vpop.permute.xlu2 %64 }
  0x63   :  { %109 = vst.msk [vmem:[%s547_s1 + $0x31] sm:$0xff] %vm104_vm2, %v65_v17 }
  0x64   :  { %143 = vst.msk [vmem:[%s547_s1 + $0x31] sm:$0xff] %vm138_vm1, %v211_v0 }
  0x65   :  { %160 = vst.msk [vmem:[%s547_s1 + $0x31] sm:$0xff] %vm155_vm3, %v211_v0 }
  0x6a   :  { %v67_v18 = vpop.permute.xlu2 %66 }
  0x6b   :  { %110 = vst.msk [vmem:[%s547_s1 + $0x39] sm:$0xff] %vm104_vm2, %v67_v18 }
  0x6c   :  { %144 = vst.msk [vmem:[%s547_s1 + $0x39] sm:$0xff] %vm138_vm1, %v211_v0 }
  0x6d   :  { %161 = vst.msk [vmem:[%s547_s1 + $0x39] sm:$0xff] %vm155_vm3, %v211_v0 }
  0x72   :  { %v73_v19 = vpop.permute.xlu2 %72 }
  0x73   :  { %113 = vst.msk [vmem:[%s547_s1 + $0x61] sm:$0xff] %vm104_vm2, %v73_v19 }
  0x74   :  { %147 = vst.msk [vmem:[%s547_s1 + $0x61] sm:$0xff] %vm138_vm1, %v211_v0 }
  0x75   :  { %164 = vst.msk [vmem:[%s547_s1 + $0x61] sm:$0xff] %vm155_vm3, %v211_v0 }
  0x79   :  { %v57_v20 = vpop.permute.xlu0 %56  ;;  %v61_v21 = vpop.permute.xlu1 %60 }
  0x7a   :  { %105 = vst.msk [vmem:[%s547_s1 + $0x1] sm:$0xff] %vm104_vm2, %v57_v20  ;;  %v79_v22 = vpop.permute.xlu2 %78 }
  0x7b   :  { %139 = vst.msk [vmem:[%s547_s1 + $0x1] sm:$0xff] %vm138_vm1, %v211_v0 }
  0x7c   :  { %156 = vst.msk [vmem:[%s547_s1 + $0x1] sm:$0xff] %vm155_vm3, %v211_v0 }
  0x7d   :  { %107 = vst.msk [vmem:[%s547_s1 + $0x19] sm:$0xff] %vm104_vm2, %v61_v21 }
  0x7e   :  { %141 = vst.msk [vmem:[%s547_s1 + $0x19] sm:$0xff] %vm138_vm1, %v211_v0 }
  0x7f   :  { %158 = vst.msk [vmem:[%s547_s1 + $0x19] sm:$0xff] %vm155_vm3, %v211_v0 }
  0x80   :  { %116 = vst.msk [vmem:[%s547_s1 + $0x81] sm:$0xff] %vm104_vm2, %v79_v22 }
  0x81   :  { %v59_v23 = vpop.permute.xlu0 %58  ;;  %v63_v24 = vpop.permute.xlu1 %62  ;;  %150 = vst.msk [vmem:[%s547_s1 + $0x81] sm:$0xff] %vm138_vm1, %v211_v0 }
  0x82   :  { %106 = vst.msk [vmem:[%s547_s1 + $0x9] sm:$0xff] %vm104_vm2, %v59_v23  ;;  %v85_v25 = vpop.permute.xlu2 %84 }
  0x83   :  { %140 = vst.msk [vmem:[%s547_s1 + $0x9] sm:$0xff] %vm138_vm1, %v211_v0 }
  0x84   :  { %157 = vst.msk [vmem:[%s547_s1 + $0x9] sm:$0xff] %vm155_vm3, %v211_v0 }
  0x85   :  { %108 = vst.msk [vmem:[%s547_s1 + $0x21] sm:$0xff] %vm104_vm2, %v63_v24 }
  0x86   :  { %142 = vst.msk [vmem:[%s547_s1 + $0x21] sm:$0xff] %vm138_vm1, %v211_v0 }
  0x87   :  { %159 = vst.msk [vmem:[%s547_s1 + $0x21] sm:$0xff] %vm155_vm3, %v211_v0 }
  0x88   :  { %167 = vst.msk [vmem:[%s547_s1 + $0x81] sm:$0xff] %vm155_vm3, %v211_v0 }
  0x89   :  { %v69_v26 = vpop.permute.xlu0 %68  ;;  %v71_v27 = vpop.permute.xlu1 %70  ;;  %119 = vst.msk [vmem:[%s547_s1 + $0xa9] sm:$0xff] %vm104_vm2, %v85_v25 }
  0x8a   :  { %111 = vst.msk [vmem:[%s547_s1 + $0x49] sm:$0xff] %vm104_vm2, %v69_v26 }
  0x8b   :  { %145 = vst.msk [vmem:[%s547_s1 + $0x49] sm:$0xff] %vm138_vm1, %v211_v0 }
  0x8c   :  { %162 = vst.msk [vmem:[%s547_s1 + $0x49] sm:$0xff] %vm155_vm3, %v211_v0 }
  0x8d   :  { %112 = vst.msk [vmem:[%s547_s1 + $0x51] sm:$0xff] %vm104_vm2, %v71_v27 }
  0x8e   :  { %146 = vst.msk [vmem:[%s547_s1 + $0x51] sm:$0xff] %vm138_vm1, %v211_v0 }
  0x8f   :  { %163 = vst.msk [vmem:[%s547_s1 + $0x51] sm:$0xff] %vm155_vm3, %v211_v0 }
  0x90   :  { %153 = vst.msk [vmem:[%s547_s1 + $0xa9] sm:$0xff] %vm138_vm1, %v211_v0 }
  0x91   :  { %v75_v28 = vpop.permute.xlu0 %74  ;;  %v77_v29 = vpop.permute.xlu1 %76  ;;  %170 = vst.msk [vmem:[%s547_s1 + $0xa9] sm:$0xff] %vm155_vm3, %v211_v0 }
  0x92   :  { %114 = vst.msk [vmem:[%s547_s1 + $0x69] sm:$0xff] %vm104_vm2, %v75_v28 }
  0x93   :  { %148 = vst.msk [vmem:[%s547_s1 + $0x69] sm:$0xff] %vm138_vm1, %v211_v0 }
  0x94   :  { %165 = vst.msk [vmem:[%s547_s1 + $0x69] sm:$0xff] %vm155_vm3, %v211_v0 }
  0x95   :  { %115 = vst.msk [vmem:[%s547_s1 + $0x79] sm:$0xff] %vm104_vm2, %v77_v29 }
  0x96   :  { %149 = vst.msk [vmem:[%s547_s1 + $0x79] sm:$0xff] %vm138_vm1, %v211_v0 }
  0x97   :  { %166 = vst.msk [vmem:[%s547_s1 + $0x79] sm:$0xff] %vm155_vm3, %v211_v0 }
  0x99   :  { %v81_v30 = vpop.permute.xlu0 %80  ;;  %v83_v31 = vpop.permute.xlu1 %82 }
  0x9a   :  { %117 = vst.msk [vmem:[%s547_s1 + $0x91] sm:$0xff] %vm104_vm2, %v81_v30 }
  0x9b   :  { %151 = vst.msk [vmem:[%s547_s1 + $0x91] sm:$0xff] %vm138_vm1, %v211_v0 }
  0x9c   :  { %168 = vst.msk [vmem:[%s547_s1 + $0x91] sm:$0xff] %vm155_vm3, %v211_v0 }
  0x9d   :  { %118 = vst.msk [vmem:[%s547_s1 + $0x99] sm:$0xff] %vm104_vm2, %v83_v31 }
  0x9e   :  { %152 = vst.msk [vmem:[%s547_s1 + $0x99] sm:$0xff] %vm138_vm1, %v211_v0 }
  0x9f   :  { %169 = vst.msk [vmem:[%s547_s1 + $0x99] sm:$0xff] %vm155_vm3, %v211_v0 }
  0xa1   :  { %v87_v32 = vpop.permute.xlu0 %86 }
  0xa2   :  { %120 = vst.msk [vmem:[%s547_s1 + $0xb1] sm:$0xff] %vm104_vm2, %v87_v32 }
  0xa3   :  { %154 = vst.msk [vmem:[%s547_s1 + $0xb1] sm:$0xff] %vm138_vm1, %v211_v0 }
  0xa4   :  { %171 = vst.msk [vmem:[%s547_s1 + $0xb1] sm:$0xff] %vm155_vm3, %v211_v0 }
  0xa5   :  { %176 = vsyncpa [#allocation3], 1 }

</bundles_post_ra>
